<compile_context>
chip_gen: v6e
topology: v6e:2x2x1
jax: 0.10.0
libtpu: 0.0.40
codegen_flags: <defaults>
</compile_context>

<pallas_src>
import functools

import jax
import jax.numpy as jnp
from jax.experimental import pallas as pl
from jax.experimental.pallas import tpu as pltpu

VOCAB = 20  # torch.nn.Embedding(20, emb_dim)


def _node_encoder_kernel(x_ref, emb_ref, out_ref, *, k_pad):
    """x_ref: (TN, F) int32 pre-shifted indices; emb_ref: (K_pad, D_pad) f32;
    out_ref: (TN, D_pad) f32."""
    tn, f = x_ref.shape
    lane_iota = jax.lax.broadcasted_iota(jnp.int32, (tn, k_pad), 1)
    # Fused one-hot: column j is hot iff some feature's shifted index equals j.
    # Segments are disjoint, so summing the F compares is exact.  F is small
    # and static (<= 9) so this unrolls at trace time; the compares are cheap
    # VPU filler hidden under the single MXU push below.
    onehot = jnp.zeros((tn, k_pad), dtype=jnp.float32)
    for i in range(f):
        onehot += (x_ref[:, i][:, None] == lane_iota).astype(jnp.float32)
    # One fused matmul on the MXU: (TN, K_pad) x (K_pad, D_pad) -> (TN, D_pad).
    out_ref[...] = jnp.dot(onehot, emb_ref[...],
                           preferred_element_type=jnp.float32)


def node_encoder(x, emb_tables, *, block_n=1024):
    """x: (N, F) int32 categorical features (values in [0, V));
    emb_tables: (F_tab, V, D) float32 stacked embedding tables.
    Returns (N, D) float32 = sum_i emb_tables[i, x[:, i], :]."""
    n, f = x.shape
    f_tab, v, d = emb_tables.shape
    assert f <= f_tab, "more features than embedding tables"

    # Fused contraction dim F*V, padded up to a multiple of 256 (maps to a
    # single 256-wide K pass on v6e/v7x, 2x128 on v5e).
    k = f * v
    k_pad = max(256, ((k + 255) // 256) * 256)
    # Lane-dense output: pad D up to a multiple of 128.
    d_pad = max(128, ((d + 127) // 128) * 128)

    # (F, V, D) -> (F*V, D) -> zero-pad to (K_pad, D_pad).  Padded rows /
    # columns are zero so they contribute nothing.
    emb_fused = emb_tables[:f].reshape(k, d).astype(jnp.float32)
    emb_fused = jnp.pad(emb_fused, ((0, k_pad - k), (0, d_pad - d)))

    # Shift each feature's indices into its own V-sized segment of the fused
    # contraction axis (done once in the wrapper, not per grid step).
    x_shift = x.astype(jnp.int32) + (jnp.arange(f, dtype=jnp.int32) * v)[None, :]

    # Tile N (sublane-aligned); pad extra rows with an out-of-range index so
    # their one-hot is all-zero and the rows are simply sliced off afterwards.
    tn = min(block_n, max(8, ((n + 7) // 8) * 8))
    n_pad = ((n + tn - 1) // tn) * tn
    if n_pad != n:
        x_shift = jnp.pad(x_shift, ((0, n_pad - n), (0, 0)),
                          constant_values=k_pad)

    kernel = functools.partial(_node_encoder_kernel, k_pad=k_pad)
    out = pl.pallas_call(
        kernel,
        out_shape=jax.ShapeDtypeStruct((n_pad, d_pad), jnp.float32),
        grid=(n_pad // tn,),
        in_specs=[
            # Per-tile node indices (pipelined, double-buffered).
            pl.BlockSpec((tn, f), lambda i: (i, 0)),
            # Fused table: same block every step -> stays resident in VMEM.
            pl.BlockSpec((k_pad, d_pad), lambda i: (0, 0)),
        ],
        out_specs=pl.BlockSpec((tn, d_pad), lambda i: (i, 0)),
        compiler_params=pltpu.CompilerParams(
            # Independent node tiles: shard across the two TCs on v7x.
            dimension_semantics=("parallel",),
        ),
    )(x_shift, emb_fused)
    return out[:n, :d]


def node_encoder_ref(x, emb_tables):
    """Pure-JAX reference mirroring the PyTorch forward."""
    acc = jnp.zeros((x.shape[0], emb_tables.shape[-1]), dtype=jnp.float32)
    for i in range(x.shape[1]):
        acc = acc + emb_tables[i][x[:, i]]
    return acc


if __name__ == "__main__":
    emb_dim = 32
    n_feat = 9

    key = jax.random.PRNGKey(0)
    k_emb, k_x1, k_x2 = jax.random.split(key, 3)

    # Deterministic parameter init: 9 embedding tables of shape (20, emb_dim),
    # N(0, 1) like torch.nn.Embedding's default init.
    emb_tables = jax.random.normal(k_emb, (9, VOCAB, emb_dim), dtype=jnp.float32)

    # Small case matching the module's toy usage (N=8 nodes).
    x_small = jax.random.randint(k_x1, (8, n_feat), 0, VOCAB, dtype=jnp.int32)
    out_small = jax.block_until_ready(node_encoder(x_small, emb_tables))
    ref_small = node_encoder_ref(x_small, emb_tables)
    assert out_small.shape == (8, emb_dim)
    assert jnp.allclose(out_small, ref_small, atol=1e-5, rtol=1e-5), \
        "mismatch vs reference (small)"

    # Larger, non-tile-multiple case to exercise the N-grid + row padding path.
    x_big = jax.random.randint(k_x2, (300, n_feat), 0, VOCAB, dtype=jnp.int32)
    out_big = jax.block_until_ready(node_encoder(x_big, emb_tables, block_n=128))
    ref_big = node_encoder_ref(x_big, emb_tables)
    assert out_big.shape == (300, emb_dim)
    assert jnp.allclose(out_big, ref_big, atol=1e-5, rtol=1e-5), \
        "mismatch vs reference (gridded)"

    print("KERNEL_OK")
</pallas_src>

<mosaic_0001>
module attributes {stable_mosaic.version = 11 : i64} {
  func.func @_node_encoder_kernel(%arg0: i32, %arg1: memref<8x9xi32, #tpu.memory_space<vmem>>, %arg2: memref<256x128xf32, #tpu.memory_space<vmem>>, %arg3: memref<8x128xf32, #tpu.memory_space<vmem>>) attributes {dimension_semantics = [#tpu.dimension_semantics<parallel>], iteration_bounds = array<i64: 1>, scalar_prefetch = 0 : i64, scratch_operands = 0 : i64, tpu.core_type = #tpu.core_type<tc>, window_params = [{transform_indices = @transform_0, window_bounds = array<i64: 8, 9>}, {pipeline_mode = #tpu.pipeline_mode<synchronous>, transform_indices = @transform_1, window_bounds = array<i64: 256, 128>}, {transform_indices = @transform_2, window_bounds = array<i64: 8, 128>}]} {
    %0 = tpu.iota {dimensions = array<i32: 1>} : vector<8x256xi32>
    %cst = arith.constant 0.000000e+00 : f32
    %1 = vector.broadcast %cst : f32 to vector<8x256xf32>
    %c0 = arith.constant 0 : index
    %c0_0 = arith.constant 0 : index
    %2 = vector.load %arg1[%c0, %c0_0] : memref<8x9xi32, #tpu.memory_space<vmem>>, vector<8x1xi32>
    %3 = vector.shape_cast %2 : vector<8x1xi32> to vector<8xi32>
    %4 = vector.shape_cast %3 : vector<8xi32> to vector<8x1xi32>
    %5 = vector.broadcast %4 : vector<8x1xi32> to vector<8x256xi32>
    %6 = arith.cmpi eq, %5, %0 : vector<8x256xi32>
    %7 = arith.extui %6 : vector<8x256xi1> to vector<8x256xi32>
    %8 = arith.sitofp %7 : vector<8x256xi32> to vector<8x256xf32>
    %9 = arith.addf %1, %8 : vector<8x256xf32>
    %c0_1 = arith.constant 0 : index
    %c1 = arith.constant 1 : index
    %10 = vector.load %arg1[%c0_1, %c1] : memref<8x9xi32, #tpu.memory_space<vmem>>, vector<8x1xi32>
    %11 = vector.shape_cast %10 : vector<8x1xi32> to vector<8xi32>
    %12 = vector.shape_cast %11 : vector<8xi32> to vector<8x1xi32>
    %13 = vector.broadcast %12 : vector<8x1xi32> to vector<8x256xi32>
    %14 = arith.cmpi eq, %13, %0 : vector<8x256xi32>
    %15 = arith.extui %14 : vector<8x256xi1> to vector<8x256xi32>
    %16 = arith.sitofp %15 : vector<8x256xi32> to vector<8x256xf32>
    %17 = arith.addf %9, %16 : vector<8x256xf32>
    %c0_2 = arith.constant 0 : index
    %c2 = arith.constant 2 : index
    %18 = vector.load %arg1[%c0_2, %c2] : memref<8x9xi32, #tpu.memory_space<vmem>>, vector<8x1xi32>
    %19 = vector.shape_cast %18 : vector<8x1xi32> to vector<8xi32>
    %20 = vector.shape_cast %19 : vector<8xi32> to vector<8x1xi32>
    %21 = vector.broadcast %20 : vector<8x1xi32> to vector<8x256xi32>
    %22 = arith.cmpi eq, %21, %0 : vector<8x256xi32>
    %23 = arith.extui %22 : vector<8x256xi1> to vector<8x256xi32>
    %24 = arith.sitofp %23 : vector<8x256xi32> to vector<8x256xf32>
    %25 = arith.addf %17, %24 : vector<8x256xf32>
    %c0_3 = arith.constant 0 : index
    %c3 = arith.constant 3 : index
    %26 = vector.load %arg1[%c0_3, %c3] : memref<8x9xi32, #tpu.memory_space<vmem>>, vector<8x1xi32>
    %27 = vector.shape_cast %26 : vector<8x1xi32> to vector<8xi32>
    %28 = vector.shape_cast %27 : vector<8xi32> to vector<8x1xi32>
    %29 = vector.broadcast %28 : vector<8x1xi32> to vector<8x256xi32>
    %30 = arith.cmpi eq, %29, %0 : vector<8x256xi32>
    %31 = arith.extui %30 : vector<8x256xi1> to vector<8x256xi32>
    %32 = arith.sitofp %31 : vector<8x256xi32> to vector<8x256xf32>
    %33 = arith.addf %25, %32 : vector<8x256xf32>
    %c0_4 = arith.constant 0 : index
    %c4 = arith.constant 4 : index
    %34 = vector.load %arg1[%c0_4, %c4] : memref<8x9xi32, #tpu.memory_space<vmem>>, vector<8x1xi32>
    %35 = vector.shape_cast %34 : vector<8x1xi32> to vector<8xi32>
    %36 = vector.shape_cast %35 : vector<8xi32> to vector<8x1xi32>
    %37 = vector.broadcast %36 : vector<8x1xi32> to vector<8x256xi32>
    %38 = arith.cmpi eq, %37, %0 : vector<8x256xi32>
    %39 = arith.extui %38 : vector<8x256xi1> to vector<8x256xi32>
    %40 = arith.sitofp %39 : vector<8x256xi32> to vector<8x256xf32>
    %41 = arith.addf %33, %40 : vector<8x256xf32>
    %c0_5 = arith.constant 0 : index
    %c5 = arith.constant 5 : index
    %42 = vector.load %arg1[%c0_5, %c5] : memref<8x9xi32, #tpu.memory_space<vmem>>, vector<8x1xi32>
    %43 = vector.shape_cast %42 : vector<8x1xi32> to vector<8xi32>
    %44 = vector.shape_cast %43 : vector<8xi32> to vector<8x1xi32>
    %45 = vector.broadcast %44 : vector<8x1xi32> to vector<8x256xi32>
    %46 = arith.cmpi eq, %45, %0 : vector<8x256xi32>
    %47 = arith.extui %46 : vector<8x256xi1> to vector<8x256xi32>
    %48 = arith.sitofp %47 : vector<8x256xi32> to vector<8x256xf32>
    %49 = arith.addf %41, %48 : vector<8x256xf32>
    %c0_6 = arith.constant 0 : index
    %c6 = arith.constant 6 : index
    %50 = vector.load %arg1[%c0_6, %c6] : memref<8x9xi32, #tpu.memory_space<vmem>>, vector<8x1xi32>
    %51 = vector.shape_cast %50 : vector<8x1xi32> to vector<8xi32>
    %52 = vector.shape_cast %51 : vector<8xi32> to vector<8x1xi32>
    %53 = vector.broadcast %52 : vector<8x1xi32> to vector<8x256xi32>
    %54 = arith.cmpi eq, %53, %0 : vector<8x256xi32>
    %55 = arith.extui %54 : vector<8x256xi1> to vector<8x256xi32>
    %56 = arith.sitofp %55 : vector<8x256xi32> to vector<8x256xf32>
    %57 = arith.addf %49, %56 : vector<8x256xf32>
    %c0_7 = arith.constant 0 : index
    %c7 = arith.constant 7 : index
    %58 = vector.load %arg1[%c0_7, %c7] : memref<8x9xi32, #tpu.memory_space<vmem>>, vector<8x1xi32>
    %59 = vector.shape_cast %58 : vector<8x1xi32> to vector<8xi32>
    %60 = vector.shape_cast %59 : vector<8xi32> to vector<8x1xi32>
    %61 = vector.broadcast %60 : vector<8x1xi32> to vector<8x256xi32>
    %62 = arith.cmpi eq, %61, %0 : vector<8x256xi32>
    %63 = arith.extui %62 : vector<8x256xi1> to vector<8x256xi32>
    %64 = arith.sitofp %63 : vector<8x256xi32> to vector<8x256xf32>
    %65 = arith.addf %57, %64 : vector<8x256xf32>
    %c0_8 = arith.constant 0 : index
    %c8 = arith.constant 8 : index
    %66 = vector.load %arg1[%c0_8, %c8] : memref<8x9xi32, #tpu.memory_space<vmem>>, vector<8x1xi32>
    %67 = vector.shape_cast %66 : vector<8x1xi32> to vector<8xi32>
    %68 = vector.shape_cast %67 : vector<8xi32> to vector<8x1xi32>
    %69 = vector.broadcast %68 : vector<8x1xi32> to vector<8x256xi32>
    %70 = arith.cmpi eq, %69, %0 : vector<8x256xi32>
    %71 = arith.extui %70 : vector<8x256xi1> to vector<8x256xi32>
    %72 = arith.sitofp %71 : vector<8x256xi32> to vector<8x256xf32>
    %73 = arith.addf %65, %72 : vector<8x256xf32>
    %c0_9 = arith.constant 0 : index
    %c0_10 = arith.constant 0 : index
    %74 = vector.load %arg2[%c0_9, %c0_10] : memref<256x128xf32, #tpu.memory_space<vmem>>, vector<256x128xf32>
    %cst_11 = arith.constant dense<0.000000e+00> : vector<8x128xf32>
    %75 = tpu.matmul %73, %74, %cst_11 {dimension_numbers = #tpu.dot_dimension_numbers<[1], [0], [0], [1], [0, 0, 1, 1], [], []>} : vector<8x256xf32>, vector<256x128xf32>, vector<8x128xf32> -> vector<8x128xf32>
    %c0_12 = arith.constant 0 : index
    %c0_13 = arith.constant 0 : index
    %76 = vector.load %arg3[%c0_12, %c0_13] : memref<8x128xf32, #tpu.memory_space<vmem>>, vector<8x128xf32>
    tpu.vector_store %arg3[%c0_12, %c0_13], %75 {strides = array<i32>} : memref<8x128xf32, #tpu.memory_space<vmem>>, vector<8x128xf32>,
    return
  }
  func.func @transform_0(%arg0: i32) -> (i32, i32) {
    %c0_i32 = arith.constant 0 : i32
    %c0_i32_0 = arith.constant 0 : i32
    return %arg0, %c0_i32 : i32, i32
  }
  func.func @transform_1(%arg0: i32) -> (i32, i32) {
    %c0_i32 = arith.constant 0 : i32
    %c0_i32_0 = arith.constant 0 : i32
    %c0_i32_1 = arith.constant 0 : i32
    return %c0_i32, %c0_i32_0 : i32, i32
  }
  func.func @transform_2(%arg0: i32) -> (i32, i32) {
    %c0_i32 = arith.constant 0 : i32
    %c0_i32_0 = arith.constant 0 : i32
    return %arg0, %c0_i32 : i32, i32
  }
}

</mosaic_0001>

<bundles_post_ra>
// kernel: tpu_custom_call.1
= control target key start
LH: loop header
LB: loop body
LE: loop exit
PB: predicated region body
PF: predicated region fallthrough
CT: control target
= control target key end

     0   :  { %7 = vsyncpa [#allocation3], 0  ;;  %s442_s0 = inlined_call_operand.hbm [shape: s32[8,9], index: 0, kind: input, shape index: {}]   ;;  %s443_s1 = inlined_call_operand.hbm [shape: f32[256,128], index: 1, kind: input, shape index: {}]   ;;  %s444_s2 = inlined_call_operand.hbm [shape: f32[8,128], index: 2, kind: output, shape index: {}]  }
   0x1   :  { %8 = vsyncpa [#allocation6], 0 }
   0x2   :  { %9 = vsyncpa [#allocation4], 0  ;;  %s403_s9 = smov [#allocation2]   ;;  %s404_s11 = smov [#allocation5]  }
   0x3   :  { %s16_s10 = sshll.u32 %s403_s9, 4  ;;  %s25_s12 = sshll.u32 %s404_s11, 4  ;;  %s17_s10 = int_to_ptr.vmem [resolvable:$true] %s16_s10  ;;  %s26_s12 = int_to_ptr.vmem [resolvable:$true] %s25_s12 }
   0x4   :  { %s345_s13 = scalar_lea.vmem %s17_s10, 128  ;;  %p350_p1 = scmp.lt.s32.totalorder %s17_s10, %s17_s10 }
   0x5   :  { %p346_p0 = scmp.ne.s32.totalorder %s17_s10, %s345_s13  ;;  %p351_p2 = scmp.lt.s32.totalorder %s345_s13, %s345_s13 }
   0x7   :  { %p352_p3 = por %p351_p2, %p350_p1 }
   0x9   :  { %p353_p4 = pnand %p352_p3, %p346_p0 }
   0xb   :  { %356 = shalt.err (!%p353_p4)
}
   0xc   :  { %19 = dma.hbm_to_vmem [thread:$0]  %s442_s0, 128, %s17_s10, [#allocation3]  }
   0xd   :  { %s365_s16 = scalar_lea.vmem %s26_s12, 4096  ;;  %p370_p6 = scmp.lt.s32.totalorder %s26_s12, %s26_s12 }
   0xe   :  { %p366_p5 = scmp.ne.s32.totalorder %s26_s12, %s365_s16  ;;  %p371_p7 = scmp.lt.s32.totalorder %s365_s16, %s365_s16 }
  0x10   :  { %p372_p8 = por %p371_p7, %p370_p6 }
  0x12   :  { %p373_p9 = pnand %p372_p8, %p366_p5 }
  0x14   :  { %376 = shalt.err (!%p373_p9)
}
  0x15   :  { %s405_s17 = smov 128   ;;  %s406_s18 = smov 8  }
  0x16   :  { %31 = dma.hbm_to_vmem [thread:$0]  %s443_s1, 4096, %s26_s12, [#allocation6], %s405_s17, %s405_s17, %s406_s18  }
  0x17   :  { %397 = dma.done.wait [#allocation3], 128  }
  0x18   :  { %398 = vsyncadd [#allocation3], 4294967168 }
  0x19   :  { %399 = dma.done.wait [#allocation6], 4096  }
  0x1a   :  { %400 = vsyncadd [#allocation6], 4294963200  ;;  %v407_v0 = vmov 2   ;;  %v408_v1 = vmov 0   ;;  %v41_v2 = vld [vmem:[#allocation2] sm:$0xff]  ;;  %v171_v5 = vld [vmem:[#allocation5 + $0xf0] sm:$0xff]  ;;  %v38_v42 = vlaneseq }
  0x1b   :  { %330 = vset.pattern.permute.xlu1 %v407_v0  ;;  %328 = vset.pattern.permute.xlu0 %v408_v1  ;;  %v172_v3 = vld [vmem:[#allocation5 + $0xf8] sm:$0xff]  ;;  %v155_v6 = vld [vmem:[#allocation5 + $0x70] sm:$0xff]  ;;  %v409_v7 = vmov 3   ;;  %v410_v8 = vmov 1   ;;  %v170_v9 = vld [vmem:[#allocation5 + $0xe8] sm:$0xff]  ;;  %v411_v12 = vmov 4  }
  0x1c   :  { %v156_v4 = vld [vmem:[#allocation5 + $0x78] sm:$0xff]  ;;  %65 = vperm.xlu1 %330, %v41_v2   ;;  %43 = vperm.xlu0 %328, %v41_v2   ;;  %v154_v10 = vld [vmem:[#allocation5 + $0x68] sm:$0xff]  ;;  %v169_v11 = vld [vmem:[#allocation5 + $0xe0] sm:$0xff]  ;;  %v412_v13 = vmov 5   ;;  %v413_v17 = vmov 6   ;;  %v414_v18 = vmov 8  }
  0x1d   :  { %278 = vmatprep.subr.mxu0 %v172_v3  ;;  %v153_v14 = vld [vmem:[#allocation5 + $0x60] sm:$0xff]  ;;  %v168_v15 = vld [vmem:[#allocation5 + $0xd8] sm:$0xff]  ;;  %v167_v19 = vld [vmem:[#allocation5 + $0xd0] sm:$0xff]  ;;  %v415_v24 = vmov 7   ;;  %v39_v43 = vand.u32 127, %v38_v42  ;;  %v416_v49 = vmov 0.0  }
  0x1e   :  { %279 = vmatpush3.msra.mxu0 %v156_v4  ;;  %v152_v16 = vld [vmem:[#allocation5 + $0x58] sm:$0xff]  ;;  %v151_v20 = vld [vmem:[#allocation5 + $0x50] sm:$0xff]  ;;  %v166_v21 = vld [vmem:[#allocation5 + $0xc8] sm:$0xff]  ;;  %s417_s0 = smov [#allocation7]  }
  0x1f   :  { %280 = vmatprep.subr.mxu0 %v171_v5  ;;  %v150_v22 = vld [vmem:[#allocation5 + $0x48] sm:$0xff]  ;;  %v165_v23 = vld [vmem:[#allocation5 + $0xc0] sm:$0xff]  ;;  %v164_v26 = vld [vmem:[#allocation5 + $0xb8] sm:$0xff]  ;;  %v40_v46 = vadd.s32 128, %v39_v43  ;;  %s250_s1 = sshll.u32 %s417_s0, 4  ;;  %s251_s1 = int_to_ptr.vmem [resolvable:$true] %s250_s1 }
  0x20   :  { %331 = vset.pattern.permute.xlu1 %v409_v7  ;;  %329 = vset.pattern.permute.xlu0 %v410_v8  ;;  %v149_v25 = vld [vmem:[#allocation5 + $0x40] sm:$0xff]  ;;  %v148_v27 = vld [vmem:[#allocation5 + $0x38] sm:$0xff]  ;;  %v163_v28 = vld [vmem:[#allocation5 + $0xb0] sm:$0xff]  ;;  %s377_s21 = scalar_lea.vmem %s251_s1, 128  ;;  %p382_p11 = scmp.lt.s32.totalorder %s251_s1, %s251_s1 }
  0x21   :  { %76 = vperm.xlu1 %331, %v41_v2   ;;  %54 = vperm.xlu0 %329, %v41_v2   ;;  %v147_v29 = vld [vmem:[#allocation5 + $0x30] sm:$0xff]  ;;  %v162_v30 = vld [vmem:[#allocation5 + $0xa8] sm:$0xff]  ;;  %v161_v32 = vld [vmem:[#allocation5 + $0xa0] sm:$0xff]  ;;  %p378_p10 = scmp.ne.s32.totalorder %s251_s1, %s377_s21  ;;  %p383_p12 = scmp.lt.s32.totalorder %s377_s21, %s377_s21 }
  0x22   :  { %281 = vmatpush3.msra.mxu0 %v155_v6  ;;  %v146_v31 = vld [vmem:[#allocation5 + $0x28] sm:$0xff]  ;;  %v145_v33 = vld [vmem:[#allocation5 + $0x20] sm:$0xff]  ;;  %v160_v34 = vld [vmem:[#allocation5 + $0x98] sm:$0xff] }
  0x23   :  { %282 = vmatprep.subr.mxu0 %v170_v9  ;;  %v144_v35 = vld [vmem:[#allocation5 + $0x18] sm:$0xff]  ;;  %v159_v36 = vld [vmem:[#allocation5 + $0x90] sm:$0xff]  ;;  %v158_v38 = vld [vmem:[#allocation5 + $0x88] sm:$0xff]  ;;  %p384_p13 = por %p383_p12, %p382_p11 }
  0x24   :  { %283 = vmatpush3.msra.mxu0 %v154_v10  ;;  %v143_v37 = vld [vmem:[#allocation5 + $0x10] sm:$0xff]  ;;  %v142_v39 = vld [vmem:[#allocation5 + $0x8] sm:$0xff]  ;;  %v157_v40 = vld [vmem:[#allocation5 + $0x80] sm:$0xff] }
  0x25   :  { %332 = vset.pattern.permute.xlu1 %v411_v12  ;;  %333 = vset.pattern.permute.xlu0 %v412_v13  ;;  %v141_v41 = vld [vmem:[#allocation5] sm:$0xff]  ;;  %p385_p0 = pnand %p384_p13, %p378_p10 }
  0x26   :  { %87 = vperm.xlu1 %332, %v41_v2   ;;  %98 = vperm.xlu0 %333, %v41_v2  }
  0x27   :  { %284 = vmatprep.subr.mxu0 %v169_v11 }
  0x28   :  { %285 = vmatpush3.msra.mxu0 %v153_v14 }
  0x29   :  { %286 = vmatprep.subr.mxu0 %v168_v15 }
  0x2a   :  { %334 = vset.pattern.permute.xlu1 %v413_v17  ;;  %336 = vset.pattern.permute.xlu0 %v414_v18 }
  0x2b   :  { %109 = vperm.xlu1 %334, %v41_v2   ;;  %131 = vperm.xlu0 %336, %v41_v2  }
  0x2c   :  { %287 = vmatpush3.msra.mxu0 %v152_v16 }
  0x2d   :  { %288 = vmatprep.subr.mxu0 %v167_v19 }
  0x2e   :  { %289 = vmatpush3.msra.mxu0 %v151_v20 }
  0x2f   :  { %335 = vset.pattern.permute.xlu1 %v415_v24  ;;  %290 = vmatprep.subr.mxu0 %v166_v21 }
  0x30   :  { %120 = vperm.xlu1 %335, %v41_v2   ;;  %291 = vmatpush3.msra.mxu0 %v150_v22 }
  0x31   :  { %292 = vmatprep.subr.mxu0 %v165_v23 }
  0x32   :  { %293 = vmatpush3.msra.mxu0 %v149_v25 }
  0x33   :  { %294 = vmatprep.subr.mxu0 %v164_v26 }
  0x34   :  { %295 = vmatpush3.msra.mxu0 %v148_v27 }
  0x35   :  { %296 = vmatprep.subr.mxu0 %v163_v28 }
  0x36   :  { %297 = vmatpush3.msra.mxu0 %v147_v29 }
  0x37   :  { %298 = vmatprep.subr.mxu0 %v162_v30 }
  0x38   :  { %299 = vmatpush3.msra.mxu0 %v146_v31 }
  0x39   :  { %300 = vmatprep.subr.mxu0 %v161_v32 }
  0x3a   :  { %301 = vmatpush3.msra.mxu0 %v145_v33 }
  0x3b   :  { %302 = vmatprep.subr.mxu0 %v160_v34 }
  0x3c   :  { %303 = vmatpush3.msra.mxu0 %v144_v35 }
  0x3d   :  { %304 = vmatprep.subr.mxu0 %v159_v36 }
  0x3e   :  { %305 = vmatpush3.msra.mxu0 %v143_v37 }
  0x3f   :  { %306 = vmatprep.subr.mxu0 %v158_v38 }
  0x40   :  { %307 = vmatpush3.msra.mxu0 %v142_v39 }
  0x41   :  { %308 = vmatprep.subr.mxu0 %v157_v40 }
  0x42   :  { %309 = vmatpush3.msra.mxu0 %v141_v41 }
  0x97   :  { %v66_v44 = vpop.permute.xlu1 %65  ;;  %v44_v45 = vpop.permute.xlu0 %43 }
  0x98   :  { %vm45_vm0 = vcmp.eq.s32.totalorder %v44_v45, %v39_v43  ;;  %vm46_vm1 = vcmp.eq.s32.totalorder %v44_v45, %v40_v46  ;;  %vm67_vm2 = vcmp.eq.s32.totalorder %v66_v44, %v39_v43  ;;  %vm68_vm3 = vcmp.eq.s32.totalorder %v66_v44, %v40_v46 }
  0x99   :  { %v260_v50 = vsel %vm45_vm0, 1.0, %v416_v49  ;;  %v261_v51 = vsel %vm46_vm1, 1.0, %v416_v49  ;;  %v264_v56 = vsel %vm67_vm2, 1.0, %v416_v49  ;;  %v265_v57 = vsel %vm68_vm3, 1.0, %v416_v49 }
  0x9c   :  { %v77_v47 = vpop.permute.xlu1 %76  ;;  %v55_v48 = vpop.permute.xlu0 %54 }
  0x9d   :  { %vm56_vm4 = vcmp.eq.s32.totalorder %v55_v48, %v39_v43  ;;  %vm57_vm5 = vcmp.eq.s32.totalorder %v55_v48, %v40_v46  ;;  %vm78_vm6 = vcmp.eq.s32.totalorder %v77_v47, %v39_v43  ;;  %vm79_vm7 = vcmp.eq.s32.totalorder %v77_v47, %v40_v46 }
  0x9e   :  { %v262_v52 = vsel %vm56_vm4, 1.0, %v416_v49  ;;  %v263_v53 = vsel %vm57_vm5, 1.0, %v416_v49  ;;  %v266_v58 = vsel %vm78_vm6, 1.0, %v416_v49  ;;  %v267_v59 = vsel %vm79_vm7, 1.0, %v416_v49 }
  0x9f   :  { %v62_v54 = vadd.f32 %v262_v52, %v260_v50  ;;  %v63_v55 = vadd.f32 %v263_v53, %v261_v51 }
  0xa1   :  { %v73_v60 = vadd.f32 %v264_v56, %v62_v54  ;;  %v74_v61 = vadd.f32 %v265_v57, %v63_v55  ;;  %v88_v62 = vpop.permute.xlu1 %87  ;;  %v99_v63 = vpop.permute.xlu0 %98 }
  0xa2   :  { %vm89_vm8 = vcmp.eq.s32.totalorder %v88_v62, %v39_v43  ;;  %vm90_vm9 = vcmp.eq.s32.totalorder %v88_v62, %v40_v46  ;;  %vm100_vm10 = vcmp.eq.s32.totalorder %v99_v63, %v39_v43  ;;  %vm101_vm11 = vcmp.eq.s32.totalorder %v99_v63, %v40_v46 }
  0xa3   :  { %v84_v0 = vadd.f32 %v266_v58, %v73_v60  ;;  %v85_v1 = vadd.f32 %v267_v59, %v74_v61  ;;  %v268_v2 = vsel %vm89_vm8, 1.0, %v416_v49  ;;  %v269_v3 = vsel %vm90_vm9, 1.0, %v416_v49 }
  0xa4   :  { %v270_v6 = vsel %vm100_vm10, 1.0, %v416_v49  ;;  %v271_v7 = vsel %vm101_vm11, 1.0, %v416_v49 }
  0xa5   :  { %v95_v4 = vadd.f32 %v268_v2, %v84_v0  ;;  %v96_v5 = vadd.f32 %v269_v3, %v85_v1 }
  0xa6   :  { %v110_v8 = vpop.permute.xlu1 %109  ;;  %v132_v9 = vpop.permute.xlu0 %131 }
  0xa7   :  { %vm111_vm12 = vcmp.eq.s32.totalorder %v110_v8, %v39_v43  ;;  %vm112_vm13 = vcmp.eq.s32.totalorder %v110_v8, %v40_v46  ;;  %v106_v10 = vadd.f32 %v270_v6, %v95_v4  ;;  %v107_v11 = vadd.f32 %v271_v7, %v96_v5 }
  0xa8   :  { %v272_v12 = vsel %vm111_vm12, 1.0, %v416_v49  ;;  %v273_v13 = vsel %vm112_vm13, 1.0, %v416_v49  ;;  %vm133_vm14 = vcmp.eq.s32.totalorder %v132_v9, %v39_v43  ;;  %vm134_vm15 = vcmp.eq.s32.totalorder %v132_v9, %v40_v46 }
  0xa9   :  { %v117_v15 = vadd.f32 %v272_v12, %v106_v10  ;;  %v118_v16 = vadd.f32 %v273_v13, %v107_v11  ;;  %v276_v19 = vsel %vm133_vm14, 1.0, %v416_v49  ;;  %v277_v20 = vsel %vm134_vm15, 1.0, %v416_v49 }
  0xab   :  { %v121_v14 = vpop.permute.xlu1 %120 }
  0xac   :  { %vm122_vm0 = vcmp.eq.s32.totalorder %v121_v14, %v39_v43  ;;  %vm123_vm1 = vcmp.eq.s32.totalorder %v121_v14, %v40_v46 }
  0xad   :  { %v274_v17 = vsel %vm122_vm0, 1.0, %v416_v49  ;;  %v275_v18 = vsel %vm123_vm1, 1.0, %v416_v49 }
  0xae   :  { %v128_v21 = vadd.f32 %v274_v17, %v117_v15  ;;  %v129_v22 = vadd.f32 %v275_v18, %v118_v16 }
  0xb0   :  { %v139_v23 = vadd.f32 %v276_v19, %v128_v21  ;;  %v140_v24 = vadd.f32 %v277_v20, %v129_v22 }
  0xb2   :  { %237 = vmatprep.mubr.f32.mxu0 %v140_v24 }
  0xb3   :  { %238 = vmatmul.mubr.f32.vlgmr.msra.gmra.mxu0 %v139_v23 }
 0x173   :  { %v310_v25 = vpop.f32.mrf.mxu0 }
 0x175   :  { %v311_v26 = vpop.f32.mrf.mxu0 }
 0x176   :  { %v312_v27 = vadd.f32 %v311_v26, %v310_v25 }
 0x178   :  { %243 = vst [vmem:[#allocation7] sm:$0xff] %v312_v27 }
 0x179   :  { %388 = shalt.err (!%p385_p0)
}
 0x17a   :  { %253 = dma.vmem_to_hbm [thread:$0]  %s251_s1, 128, %s444_s2, [#allocation4]  }
 0x17b   :  { %401 = dma.done.wait [#allocation4], 128  }
 0x17c   :  { %402 = vsyncadd [#allocation4], 4294967168 }
 0x17d   :  { %257 = vsyncpa [#allocation3], 1 }
 0x17e   :  { %258 = vsyncpa [#allocation6], 1 }
 0x17f   :  { %259 = vsyncpa [#allocation4], 1 }

</bundles_post_ra>
